<compile_context>
chip_gen: v7x
topology: tpu7x:2x2x1
jax: 0.10.0
libtpu: 0.0.40
codegen_flags: <defaults>
</compile_context>

<pallas_src>
import functools
import math

import jax
import jax.numpy as jnp
from jax.experimental import pallas as pl
from jax.experimental.pallas import tpu as pltpu


# ----------------------------- kernels ---------------------------------------


def _hidden(x_ref, w1_ref, b1_ref, w2_ref, b2_ref, compute_dtype):
    """Feature-major hidden features h2 = relu(W2 @ relu(W1 @ x^T + b1) + b2).

    x_ref is the batch-major (tb, n_input) tile; the transpose is folded into the
    MXU contraction (NT matmul), so no explicit transpose op is emitted.
    """
    x = x_ref[...].astype(compute_dtype)                         # state.float() (or bf16)
    w1 = w1_ref[...].astype(compute_dtype)                       # (n_feat, n_in)
    h1 = jax.lax.dot_general(                                    # NT: contract n_in axes
        w1, x, (((1,), (1,)), ((), ())),
        preferred_element_type=jnp.float32) + b1_ref[...]        # (n_feat, tb), f32
    h1 = jnp.maximum(h1, 0.0)                                    # relu (f32 VALU, v5e-safe)
    w2 = w2_ref[...].astype(compute_dtype)
    h2 = jnp.dot(w2, h1.astype(compute_dtype),
                 preferred_element_type=jnp.float32) + b2_ref[...]
    return jnp.maximum(h2, 0.0)                                  # (n_feat, tb), f32


def _q_kernel(x_ref, w1_ref, b1_ref, w2_ref, b2_ref, w3t_ref, b3row_ref, q_ref,
              *, compute_dtype):
    """Full q, stored batch-major (tb, n_output) so no wrapper transpose is needed."""
    h2 = _hidden(x_ref, w1_ref, b1_ref, w2_ref, b2_ref, compute_dtype)
    w3t = w3t_ref[...].astype(compute_dtype)                     # (n_feat, n_out)
    q = jax.lax.dot_general(                                     # TN: (tb, n_out)
        h2.astype(compute_dtype), w3t, (((0,), (0,)), ((), ())),
        preferred_element_type=jnp.float32) + b3row_ref[...]
    q_ref[...] = q.astype(q_ref.dtype)


def _q_acted_kernel(x_ref, a_ref, w1_ref, b1_ref, w2_ref, b2_ref, w3_ref, b3_ref,
                    qa_ref, *, compute_dtype):
    """Fused gather: q_acted = q[b, action[b]], lane-dense (1, tb) output."""
    h2 = _hidden(x_ref, w1_ref, b1_ref, w2_ref, b2_ref, compute_dtype)
    w3 = w3_ref[...].astype(compute_dtype)
    q_t = jnp.dot(w3, h2.astype(compute_dtype),
                  preferred_element_type=jnp.float32) + b3_ref[...]   # (n_out, tb)
    row = jax.lax.broadcasted_iota(jnp.int32, q_t.shape, 0)
    qa = jnp.sum(jnp.where(row == a_ref[...], q_t, 0.0), axis=0, keepdims=True)
    qa_ref[...] = qa.astype(qa_ref.dtype)


def _q_max_kernel(x_ref, w1_ref, b1_ref, w2_ref, b2_ref, w3_ref, b3_ref,
                  qm_ref, *, compute_dtype):
    """Fused DQN target path: max_a q[b, a], lane-dense (1, tb) output."""
    h2 = _hidden(x_ref, w1_ref, b1_ref, w2_ref, b2_ref, compute_dtype)
    w3 = w3_ref[...].astype(compute_dtype)
    q_t = jnp.dot(w3, h2.astype(compute_dtype),
                  preferred_element_type=jnp.float32) + b3_ref[...]   # (n_out, tb)
    qm_ref[...] = jnp.max(q_t, axis=0, keepdims=True).astype(qm_ref.dtype)


# ----------------------------- tiling helpers ---------------------------------


def _round_up(x, m):
    return m * pl.cdiv(x, m)


def _tensorcores_per_chip():
    """v7x has 2 TensorCores per chip; v5e/v6e have 1. Defensive default = 1."""
    try:
        kind = str(jax.devices()[0].device_kind).lower()
    except Exception:  # pragma: no cover
        return 1
    return 2 if "v7" in kind else 1


def _pick_batch_tile(B, batch_tile):
    batch_tile = max(128, _round_up(int(batch_tile), 128))       # enforce 128-lane multiple
    target = batch_tile
    ncores = _tensorcores_per_chip()
    if ncores > 1 and B >= 256:
        # Give the "parallel" batch grid >= ncores steps so both v7x TCs are used.
        target = min(target, _round_up(pl.cdiv(B, ncores), 128))
    if B <= target:
        return B                                                  # single (ragged) block
    return target                                                 # tiled grid, ragged tail


def _bspec(shape, index_map, buffer_count=None):
    if buffer_count is not None and hasattr(pl, "Buffered"):
        try:
            return pl.BlockSpec(shape, index_map, pipeline_mode=pl.Buffered(buffer_count))
        except TypeError:
            pass
    return pl.BlockSpec(shape, index_map)


# ----------------------------- core dispatcher ---------------------------------


def _forward_impl(state, params, action_row, mode, batch_tile, compute_dtype):
    """state: (B, n_input) torch layout. action_row: (1, B) int32 or None.

    mode: "q" -> (B, n_output); "acted" / "max" -> (1, B).
    """
    compute_dtype = jnp.float32 if compute_dtype is None else compute_dtype
    w1, b1 = params["w1"], params["b1"]
    w2, b2 = params["w2"], params["b2"]
    w3, b3 = params["w3"], params["b3"]
    B, n_input = state.shape
    n_features = w1.shape[0]
    n_output = w3.shape[0]

    tb = _pick_batch_tile(B, batch_tile)
    grid_steps = int(pl.cdiv(B, tb))
    grid = (grid_steps,)
    nbuf = 3 if grid_steps > 1 else None                          # deeper input pipelining

    const = lambda i: (0, 0)                                      # weights stay VMEM-resident
    x_spec = _bspec((tb, n_input), lambda i: (i, 0), buffer_count=nbuf)
    w12_specs = [_bspec(a.shape, const) for a in (w1, b1, w2, b2)]

    flops = 2 * B * (n_input * n_features + n_features * n_features + n_features * n_output)
    w_bytes = sum(int(a.size) * a.dtype.itemsize for a in (w1, b1, w2, b2, w3, b3))
    in_bytes = B * n_input * state.dtype.itemsize
    cparams = pltpu.CompilerParams(dimension_semantics=("parallel",))

    if mode == "q":
        # Parameter-sized prep only (384 B / 12 B); not per-sample data-path traffic.
        w3_t = w3.T                                               # (n_features, n_output)
        b3_row = b3.reshape(1, n_output)                          # (1, n_output)
        cost = pl.CostEstimate(flops=flops, transcendentals=0,
                               bytes_accessed=in_bytes + B * n_output * 4 + w_bytes)
        return pl.pallas_call(
            functools.partial(_q_kernel, compute_dtype=compute_dtype),
            grid=grid,
            in_specs=[x_spec] + w12_specs + [_bspec(w3_t.shape, const),
                                             _bspec(b3_row.shape, const)],
            out_specs=_bspec((tb, n_output), lambda i: (i, 0)),
            out_shape=jax.ShapeDtypeStruct((B, n_output), jnp.float32),
            compiler_params=cparams,
            cost_estimate=cost,
        )(state, w1, b1, w2, b2, w3_t, b3_row)

    w3b3_specs = [_bspec(w3.shape, const), _bspec(b3.shape, const)]
    out_spec = _bspec((1, tb), lambda i: (0, i))                  # lane-dense (1, B) output
    out_shape = jax.ShapeDtypeStruct((1, B), jnp.float32)

    if mode == "max":
        cost = pl.CostEstimate(flops=flops, transcendentals=0,
                               bytes_accessed=in_bytes + B * 4 + w_bytes)
        return pl.pallas_call(
            functools.partial(_q_max_kernel, compute_dtype=compute_dtype),
            grid=grid,
            in_specs=[x_spec] + w12_specs + w3b3_specs,
            out_specs=out_spec,
            out_shape=out_shape,
            compiler_params=cparams,
            cost_estimate=cost,
        )(state, w1, b1, w2, b2, w3, b3)

    # mode == "acted"
    a_spec = _bspec((1, tb), lambda i: (0, i), buffer_count=nbuf)
    cost = pl.CostEstimate(flops=flops, transcendentals=0,
                           bytes_accessed=in_bytes + 2 * B * 4 + w_bytes)
    return pl.pallas_call(
        functools.partial(_q_acted_kernel, compute_dtype=compute_dtype),
        grid=grid,
        in_specs=[x_spec, a_spec] + w12_specs + w3b3_specs,
        out_specs=out_spec,
        out_shape=out_shape,
        compiler_params=cparams,
        cost_estimate=cost,
    )(state, action_row, w1, b1, w2, b2, w3, b3)


# ----------------------------- public wrappers ---------------------------------


def _maybe_pad_batch(state, action, pad_small_batch):
    B = state.shape[0]
    if not pad_small_batch or B >= 128:
        return state, action, B, B
    Bp = 128
    state = jnp.pad(state, ((0, Bp - B), (0, 0)))
    if action is not None:
        action = jnp.pad(action, ((0, Bp - B), (0, 0)))
    return state, action, B, Bp


def network_forward(state, params, action=None, *, batch_tile=512,
                    compute_dtype=None, pad_small_batch=True):
    """Matches Network.forward: q (B, n_output) or q_acted (B,) when action is given.

    state:  (B, n_input), any float/int dtype (cast in-kernel, like state.float()).
    action: optional (B, 1) integer array.
    q_acted is returned with shape (B,) even for B == 1 (torch.squeeze would give 0-d).
    """
    state, action, B, Bp = _maybe_pad_batch(state, action, pad_small_batch)
    if action is None:
        q = _forward_impl(state, params, None, "q", batch_tile, compute_dtype)
        return q[:B] if Bp != B else q
    action_row = action.astype(jnp.int32).reshape(1, Bp)
    qa = _forward_impl(state, params, action_row, "acted", batch_tile, compute_dtype)
    qa = qa.reshape(Bp)
    return qa[:B] if Bp != B else qa


def network_forward_max(state, params, *, batch_tile=512,
                        compute_dtype=None, pad_small_batch=True):
    """Fused DQN target path: max_a q(state, a), shape (B,). Avoids materializing q."""
    state, _, B, Bp = _maybe_pad_batch(state, None, pad_small_batch)
    qm = _forward_impl(state, params, None, "max", batch_tile, compute_dtype)
    qm = qm.reshape(Bp)
    return qm[:B] if Bp != B else qm


# ----------------------------- init (torch-equivalent) ------------------------


def _xavier_uniform(key, shape, gain):
    fan_out, fan_in = shape                              # torch Linear weight is (out, in)
    bound = gain * math.sqrt(6.0 / (fan_in + fan_out))
    return jax.random.uniform(key, shape, jnp.float32, -bound, bound)


def init_params(key, n_input, n_features, n_output):
    kw1, kw2, kw3, kb1, kb2, kb3 = jax.random.split(key, 6)
    relu_gain = math.sqrt(2.0)                           # calculate_gain('relu')
    lin_gain = 1.0                                       # calculate_gain('linear')

    def bias(k, fan_in, out_dim):
        # torch nn.Linear default bias init: U(-1/sqrt(fan_in), 1/sqrt(fan_in))
        b = 1.0 / math.sqrt(fan_in)
        return jax.random.uniform(k, (out_dim, 1), jnp.float32, -b, b)

    return {
        "w1": _xavier_uniform(kw1, (n_features, n_input), relu_gain),
        "b1": bias(kb1, n_input, n_features),
        "w2": _xavier_uniform(kw2, (n_features, n_features), relu_gain),
        "b2": bias(kb2, n_features, n_features),
        "w3": _xavier_uniform(kw3, (n_output, n_features), lin_gain),
        "b3": bias(kb3, n_features, n_output),
    }


# ----------------------------- test -------------------------------------------

if __name__ == "__main__":
    key = jax.random.PRNGKey(0)
    k_params, k_s1, k_a1, k_s2, k_a2 = jax.random.split(key, 5)

    batch, n_input, n_features, n_output = 2, 4, 32, 3
    params = init_params(k_params, n_input, n_features, n_output)

    def reference_q(state):
        h1 = jnp.maximum(state.astype(jnp.float32) @ params["w1"].T + params["b1"].T, 0.0)
        h2 = jnp.maximum(h1 @ params["w2"].T + params["b2"].T, 0.0)
        return h2 @ params["w3"].T + params["b3"].T

    # --- tiny per-env-step batch (padded internally to one 128-lane tile) ---
    state = jax.random.normal(k_s1, (batch, n_input), jnp.float32)
    action = jax.random.randint(k_a1, (batch, 1), 0, n_output)
    q_ref_small = reference_q(state)

    q = network_forward(state, params)
    jax.block_until_ready(q)
    assert q.shape == (batch, n_output)
    assert jnp.allclose(q, q_ref_small, atol=3e-5), "q mismatch vs reference"

    qa = network_forward(state, params, action)
    jax.block_until_ready(qa)
    assert qa.shape == (batch,)
    assert jnp.allclose(qa, q_ref_small[jnp.arange(batch), action[:, 0]], atol=3e-5), \
        "q_acted mismatch vs reference"

    qm = network_forward_max(state, params)
    jax.block_until_ready(qm)
    assert qm.shape == (batch,)
    assert jnp.allclose(qm, q_ref_small.max(axis=1), atol=3e-5), "q_max mismatch vs reference"

    # --- replay-sized batch: multiple default (512-lane) tiles + ragged tail ---
    big_b = 1200
    state_b = jax.random.normal(k_s2, (big_b, n_input), jnp.float32)
    action_b = jax.random.randint(k_a2, (big_b, 1), 0, n_output)
    q_ref_big = reference_q(state_b)

    q_b = network_forward(state_b, params)
    qa_b = network_forward(state_b, params, action_b)
    qm_b = network_forward_max(state_b, params)
    jax.block_until_ready((q_b, qa_b, qm_b))
    assert jnp.allclose(q_b, q_ref_big, atol=3e-5), "tiled q mismatch"
    assert jnp.allclose(qa_b, q_ref_big[jnp.arange(big_b), action_b[:, 0]], atol=3e-5), \
        "tiled q_acted mismatch"
    assert jnp.allclose(qm_b, q_ref_big.max(axis=1), atol=3e-5), "tiled q_max mismatch"

    # --- optional bf16 matmul operands (f32 accumulation), v6e/v7x fast path ---
    q_bf16 = network_forward(state_b, params, compute_dtype=jnp.bfloat16)
    jax.block_until_ready(q_bf16)
    assert q_bf16.shape == (big_b, n_output)
    assert float(jnp.max(jnp.abs(q_bf16 - q_ref_big))) < 8e-2, "bf16 path too far from f32"

    print("KERNEL_OK")
</pallas_src>

<mosaic_0001>
module attributes {stable_mosaic.version = 11 : i64} {
  func.func @_q_kernel(%arg0: i32, %arg1: memref<128x4xf32, #tpu.memory_space<vmem>>, %arg2: memref<32x4xf32, #tpu.memory_space<vmem>>, %arg3: memref<32x1xf32, #tpu.memory_space<vmem>>, %arg4: memref<32x32xf32, #tpu.memory_space<vmem>>, %arg5: memref<32x1xf32, #tpu.memory_space<vmem>>, %arg6: memref<32x3xf32, #tpu.memory_space<vmem>>, %arg7: memref<1x3xf32, #tpu.memory_space<vmem>>, %arg8: memref<128x3xf32, #tpu.memory_space<vmem>>) attributes {dimension_semantics = [#tpu.dimension_semantics<parallel>], iteration_bounds = array<i64: 1>, scalar_prefetch = 0 : i64, scratch_operands = 0 : i64, tpu.core_type = #tpu.core_type<tc>, window_params = [{transform_indices = @transform_0, window_bounds = array<i64: 128, 4>}, {pipeline_mode = #tpu.pipeline_mode<synchronous>, transform_indices = @transform_1, window_bounds = array<i64: 32, 4>}, {pipeline_mode = #tpu.pipeline_mode<synchronous>, transform_indices = @transform_2, window_bounds = array<i64: 32, 1>}, {pipeline_mode = #tpu.pipeline_mode<synchronous>, transform_indices = @transform_3, window_bounds = array<i64: 32, 32>}, {pipeline_mode = #tpu.pipeline_mode<synchronous>, transform_indices = @transform_4, window_bounds = array<i64: 32, 1>}, {pipeline_mode = #tpu.pipeline_mode<synchronous>, transform_indices = @transform_5, window_bounds = array<i64: 32, 3>}, {pipeline_mode = #tpu.pipeline_mode<synchronous>, transform_indices = @transform_6, window_bounds = array<i64: 1, 3>}, {transform_indices = @transform_7, window_bounds = array<i64: 128, 3>}]} {
    %c0 = arith.constant 0 : index
    %c0_0 = arith.constant 0 : index
    %0 = vector.load %arg1[%c0, %c0_0] : memref<128x4xf32, #tpu.memory_space<vmem>>, vector<128x4xf32>
    %c0_1 = arith.constant 0 : index
    %c0_2 = arith.constant 0 : index
    %1 = vector.load %arg2[%c0_1, %c0_2] : memref<32x4xf32, #tpu.memory_space<vmem>>, vector<32x4xf32>
    %cst = arith.constant dense<0.000000e+00> : vector<32x128xf32>
    %2 = tpu.matmul %1, %0, %cst {dimension_numbers = #tpu.dot_dimension_numbers<[1], [1], [0], [0], [0, 0, 1, 0], [], []>} : vector<32x4xf32>, vector<128x4xf32>, vector<32x128xf32> -> vector<32x128xf32>
    %c0_3 = arith.constant 0 : index
    %c0_4 = arith.constant 0 : index
    %3 = vector.load %arg3[%c0_3, %c0_4] : memref<32x1xf32, #tpu.memory_space<vmem>>, vector<32x1xf32>
    %4 = vector.broadcast %3 : vector<32x1xf32> to vector<32x128xf32>
    %5 = arith.addf %2, %4 : vector<32x128xf32>
    %cst_5 = arith.constant 0.000000e+00 : f32
    %6 = vector.broadcast %cst_5 : f32 to vector<32x128xf32>
    %7 = arith.maximumf %5, %6 : vector<32x128xf32>
    %c0_6 = arith.constant 0 : index
    %c0_7 = arith.constant 0 : index
    %8 = vector.load %arg4[%c0_6, %c0_7] : memref<32x32xf32, #tpu.memory_space<vmem>>, vector<32x32xf32>
    %cst_8 = arith.constant dense<0.000000e+00> : vector<32x128xf32>
    %9 = tpu.matmul %8, %7, %cst_8 {dimension_numbers = #tpu.dot_dimension_numbers<[1], [0], [0], [1], [0, 0, 1, 1], [], []>} : vector<32x32xf32>, vector<32x128xf32>, vector<32x128xf32> -> vector<32x128xf32>
    %c0_9 = arith.constant 0 : index
    %c0_10 = arith.constant 0 : index
    %10 = vector.load %arg5[%c0_9, %c0_10] : memref<32x1xf32, #tpu.memory_space<vmem>>, vector<32x1xf32>
    %11 = vector.broadcast %10 : vector<32x1xf32> to vector<32x128xf32>
    %12 = arith.addf %9, %11 : vector<32x128xf32>
    %cst_11 = arith.constant 0.000000e+00 : f32
    %13 = vector.broadcast %cst_11 : f32 to vector<32x128xf32>
    %14 = arith.maximumf %12, %13 : vector<32x128xf32>
    %c0_12 = arith.constant 0 : index
    %c0_13 = arith.constant 0 : index
    %15 = vector.load %arg6[%c0_12, %c0_13] : memref<32x3xf32, #tpu.memory_space<vmem>>, vector<32x3xf32>
    %cst_14 = arith.constant dense<0.000000e+00> : vector<128x3xf32>
    %16 = tpu.matmul %14, %15, %cst_14 {dimension_numbers = #tpu.dot_dimension_numbers<[0], [0], [1], [1], [0, 1, 1, 1], [], []>} : vector<32x128xf32>, vector<32x3xf32>, vector<128x3xf32> -> vector<128x3xf32>
    %c0_15 = arith.constant 0 : index
    %c0_16 = arith.constant 0 : index
    %17 = vector.load %arg7[%c0_15, %c0_16] : memref<1x3xf32, #tpu.memory_space<vmem>>, vector<1x3xf32>
    %18 = vector.broadcast %17 : vector<1x3xf32> to vector<128x3xf32>
    %19 = arith.addf %16, %18 : vector<128x3xf32>
    %c0_17 = arith.constant 0 : index
    %c0_18 = arith.constant 0 : index
    %20 = vector.load %arg8[%c0_17, %c0_18] : memref<128x3xf32, #tpu.memory_space<vmem>>, vector<128x3xf32>
    tpu.vector_store %arg8[%c0_17, %c0_18], %19 {strides = array<i32>} : memref<128x3xf32, #tpu.memory_space<vmem>>, vector<128x3xf32>,
    return
  }
  func.func @transform_0(%arg0: i32) -> (i32, i32) {
    %c0_i32 = arith.constant 0 : i32
    %c0_i32_0 = arith.constant 0 : i32
    return %arg0, %c0_i32 : i32, i32
  }
  func.func @transform_1(%arg0: i32) -> (i32, i32) {
    %c0_i32 = arith.constant 0 : i32
    %c0_i32_0 = arith.constant 0 : i32
    %c0_i32_1 = arith.constant 0 : i32
    return %c0_i32, %c0_i32_0 : i32, i32
  }
  func.func @transform_2(%arg0: i32) -> (i32, i32) {
    %c0_i32 = arith.constant 0 : i32
    %c0_i32_0 = arith.constant 0 : i32
    %c0_i32_1 = arith.constant 0 : i32
    return %c0_i32, %c0_i32_0 : i32, i32
  }
  func.func @transform_3(%arg0: i32) -> (i32, i32) {
    %c0_i32 = arith.constant 0 : i32
    %c0_i32_0 = arith.constant 0 : i32
    %c0_i32_1 = arith.constant 0 : i32
    return %c0_i32, %c0_i32_0 : i32, i32
  }
  func.func @transform_4(%arg0: i32) -> (i32, i32) {
    %c0_i32 = arith.constant 0 : i32
    %c0_i32_0 = arith.constant 0 : i32
    %c0_i32_1 = arith.constant 0 : i32
    return %c0_i32, %c0_i32_0 : i32, i32
  }
  func.func @transform_5(%arg0: i32) -> (i32, i32) {
    %c0_i32 = arith.constant 0 : i32
    %c0_i32_0 = arith.constant 0 : i32
    %c0_i32_1 = arith.constant 0 : i32
    return %c0_i32, %c0_i32_0 : i32, i32
  }
  func.func @transform_6(%arg0: i32) -> (i32, i32) {
    %c0_i32 = arith.constant 0 : i32
    %c0_i32_0 = arith.constant 0 : i32
    %c0_i32_1 = arith.constant 0 : i32
    return %c0_i32, %c0_i32_0 : i32, i32
  }
  func.func @transform_7(%arg0: i32) -> (i32, i32) {
    %c0_i32 = arith.constant 0 : i32
    %c0_i32_0 = arith.constant 0 : i32
    return %arg0, %c0_i32 : i32, i32
  }
}

</mosaic_0001>

<bundles_post_ra>
// kernel: tpu_custom_call.1
= control target key start
LH: loop header
LB: loop body
LE: loop exit
PB: predicated region body
PF: predicated region fallthrough
CT: control target
= control target key end

     0   :  { %vm70_vm0 = vcmask 31744   ;;  %v848_v3 = vmov 0   ;;  %vm248_vm2 = vcmask 261120   ;;  %vm586_vm3 = vcmask 23552   ;;  %s1126_s0 = inlined_call_operand.vmem [shape: f32[128,4], index: 0, kind: input, shape index: {}]   ;;  %s1127_s1 = inlined_call_operand.vmem [shape: f32[32,4], index: 1, kind: input, shape index: {}]   ;;  %s1128_s2 = inlined_call_operand.vmem [shape: f32[32,1], index: 2, kind: input, shape index: {}]   ;;  %s1129_s4 = inlined_call_operand.vmem [shape: f32[32,1], index: 4, kind: input, shape index: {}]   ;;  %s1130_s3 = inlined_call_operand.vmem [shape: f32[32,32], index: 3, kind: input, shape index: {}]   ;;  %s1131_s5 = inlined_call_operand.vmem [shape: f32[32,3], index: 5, kind: input, shape index: {}]   ;;  %s1132_s6 = inlined_call_operand.vmem [shape: f32[1,3], index: 6, kind: input, shape index: {}]   ;;  %s1133_s7 = inlined_call_operand.vmem [shape: f32[128,3], index: 7, kind: output, shape index: {}]  }
   0x1   :  { %v26_v0 = vld [vmem:[%s1126_s0] sm:$0xff]  ;;  %v27_v1 = vld [vmem:[%s1126_s0 + $0x8] sm:$0xff]  ;;  %vm897_vm1 = vmpackc.low %vm70_vm0, %vm70_vm0  ;;  %846 = vset.pattern.permute.xlu0 %v848_v3  ;;  %847 = vset.pattern.permute.xlu1 %v848_v3 }
   0x2   :  { %v780_v4 = vpack.c.bf16 %v27_v1, %v26_v0  ;;  %v28_v5 = vld [vmem:[%s1126_s0 + $0x10] sm:$0xff]  ;;  %v29_v6 = vld [vmem:[%s1126_s0 + $0x18] sm:$0xff]  ;;  %v42_v8 = vld [vmem:[%s1127_s1] sm:$0xff] }
   0x3   :  { %v786_v7 = vpack.c.bf16 %v29_v6, %v28_v5  ;;  %v30_v9 = vld [vmem:[%s1126_s0 + $0x20] sm:$0xff]  ;;  %v31_v10 = vld [vmem:[%s1126_s0 + $0x28] sm:$0xff]  ;;  %728 = vmatprep.mubr.msk.f32.mxu0 %vm70_vm0, %v42_v8  ;;  %v48_v12 = vld [vmem:[%s1128_s2 + $0x10] sm:$0xff] }
   0x4   :  { %782 = vmatprep.subr.msk.bf16.mxu0 %vm897_vm1, %v780_v4  ;;  %v46_v11 = vld [vmem:[%s1128_s2] sm:$0xff]  ;;  %62 = vperm.xlu1 %847, %v48_v12   ;;  %v792_v13 = vpack.c.bf16 %v31_v10, %v30_v9  ;;  %v47_v14 = vld [vmem:[%s1128_s2 + $0x8] sm:$0xff]  ;;  %v49_v15 = vld [vmem:[%s1128_s2 + $0x18] sm:$0xff] }
   0x5   :  { %785 = vmatpush3.bf16.xpose.msk.msra.mxu0 %vm897_vm1, %v780_v4  ;;  %52 = vperm.xlu0 %846, %v46_v11   ;;  %v224_v16 = vld [vmem:[%s1129_s4] sm:$0xff]  ;;  %v32_v17 = vld [vmem:[%s1126_s0 + $0x30] sm:$0xff]  ;;  %v33_v18 = vld [vmem:[%s1126_s0 + $0x38] sm:$0xff] }
   0x6   :  { %788 = vmatprep.subr.msk.bf16.mxu0 %vm897_vm1, %v786_v7  ;;  %v225_v19 = vld [vmem:[%s1129_s4 + $0x8] sm:$0xff]  ;;  %v798_v20 = vpack.c.bf16 %v33_v18, %v32_v17  ;;  %v226_v21 = vld [vmem:[%s1129_s4 + $0x10] sm:$0xff]  ;;  %v227_v22 = vld [vmem:[%s1129_s4 + $0x18] sm:$0xff] }
   0x7   :  { %v34_v23 = vld [vmem:[%s1126_s0 + $0x40] sm:$0xff]  ;;  %v35_v24 = vld [vmem:[%s1126_s0 + $0x48] sm:$0xff]  ;;  %v36_v26 = vld [vmem:[%s1126_s0 + $0x50] sm:$0xff] }
   0x8   :  { %67 = vperm.xlu1 %847, %v49_v15   ;;  %v804_v25 = vpack.c.bf16 %v35_v24, %v34_v23  ;;  %v37_v27 = vld [vmem:[%s1126_s0 + $0x58] sm:$0xff]  ;;  %v38_v29 = vld [vmem:[%s1126_s0 + $0x60] sm:$0xff]  ;;  %v39_v30 = vld [vmem:[%s1126_s0 + $0x68] sm:$0xff] }
   0x9   :  { %57 = vperm.xlu0 %846, %v47_v14   ;;  %v810_v28 = vpack.c.bf16 %v37_v27, %v36_v26  ;;  %v816_v31 = vpack.c.bf16 %v39_v30, %v38_v29  ;;  %v40_v32 = vld [vmem:[%s1126_s0 + $0x70] sm:$0xff]  ;;  %v41_v33 = vld [vmem:[%s1126_s0 + $0x78] sm:$0xff]  ;;  %v43_v35 = vld [vmem:[%s1127_s1 + $0x8] sm:$0xff] }
   0xa   :  { %v822_v34 = vpack.c.bf16 %v41_v33, %v40_v32  ;;  %v44_v36 = vld [vmem:[%s1127_s1 + $0x10] sm:$0xff]  ;;  %v45_v37 = vld [vmem:[%s1127_s1 + $0x18] sm:$0xff]  ;;  %v220_v38 = vld [vmem:[%s1130_s3] sm:$0xff] }
   0xb   :  { %742 = vmatprep.mubr.msk.f32.mxu1 %vm248_vm2, %v220_v38  ;;  %v221_v57 = vld [vmem:[%s1130_s3 + $0x8] sm:$0xff]  ;;  %v222_v58 = vld [vmem:[%s1130_s3 + $0x10] sm:$0xff]  ;;  %v223_v59 = vld [vmem:[%s1130_s3 + $0x18] sm:$0xff] }
   0xc   :  { %235 = vperm.xlu1 %847, %v225_v19   ;;  %v350_v60 = vld [vmem:[%s1131_s5] sm:$0xff]  ;;  %v351_v61 = vld [vmem:[%s1131_s5 + $0x8] sm:$0xff]  ;;  %v353_v8 = vld [vmem:[%s1131_s5 + $0x18] sm:$0xff] }
   0xd   :  { %791 = vmatpush3.bf16.xpose.msk.msra.mxu0 %vm897_vm1, %v786_v7  ;;  %230 = vperm.xlu0 %846, %v224_v16   ;;  %v836_v62 = vpack.c.bf16 %v351_v61, %v350_v60  ;;  %v352_v7 = vld [vmem:[%s1131_s5 + $0x10] sm:$0xff] }
   0xe   :  { %794 = vmatprep.subr.msk.bf16.mxu0 %vm897_vm1, %v792_v13  ;;  %v840_v10 = vpack.c.bf16 %v353_v8, %v352_v7 }
  0x10   :  { %245 = vperm.xlu1 %847, %v227_v22  }
  0x11   :  { %240 = vperm.xlu0 %846, %v226_v21  }
  0x15   :  { %797 = vmatpush3.bf16.xpose.msk.msra.mxu0 %vm897_vm1, %v792_v13 }
  0x16   :  { %800 = vmatprep.subr.msk.bf16.mxu0 %vm897_vm1, %v798_v20 }
  0x1d   :  { %803 = vmatpush3.bf16.xpose.msk.msra.mxu0 %vm897_vm1, %v798_v20 }
  0x1e   :  { %806 = vmatprep.subr.msk.bf16.mxu0 %vm897_vm1, %v804_v25 }
  0x25   :  { %809 = vmatpush3.bf16.xpose.msk.msra.mxu0 %vm897_vm1, %v804_v25 }
  0x26   :  { %812 = vmatprep.subr.msk.bf16.mxu0 %vm897_vm1, %v810_v28 }
  0x2d   :  { %815 = vmatpush3.bf16.xpose.msk.msra.mxu0 %vm897_vm1, %v810_v28 }
  0x2e   :  { %818 = vmatprep.subr.msk.bf16.mxu0 %vm897_vm1, %v816_v31 }
  0x35   :  { %821 = vmatpush3.bf16.xpose.msk.msra.mxu0 %vm897_vm1, %v816_v31 }
  0x36   :  { %824 = vmatprep.subr.msk.bf16.mxu0 %vm897_vm1, %v822_v34 }
  0x3d   :  { %827 = vmatpush3.bf16.xpose.msk.msra.mxu0 %vm897_vm1, %v822_v34  ;;  %v631_v34 = vld [vmem:[%s1132_s6] ss:$0 sm:$0xff] }
  0x44   :  { %729 = vmatmul.mubr.msk.f32.vlgmr.msra.gmra.mrb[0].mxu0 %vm70_vm0, %v43_v35 }
  0x45   :  { %731 = vmatprep.mubr.msk.f32.mxu0 %vm70_vm0, %v44_v36 }
  0x48   :  { %732 = vmatmul.mubr.msk.f32.gmra.mrb[2].mxu0 %vm70_vm0, %v45_v37 }
  0x83   :  { %v63_v40 = vpop.permute.xlu1 %62 }
  0x84   :  { %v53_v39 = vpop.permute.xlu0 %52 }
  0x87   :  { %v68_v47 = vpop.permute.xlu1 %67 }
  0x88   :  { %v58_v41 = vpop.permute.xlu0 %57 }
  0x8b   :  { %v236_v3 = vpop.permute.xlu1 %235 }
  0x8c   :  { %v231_v0 = vpop.permute.xlu0 %230 }
  0x8f   :  { %v246_v14 = vpop.permute.xlu1 %245 }
  0x90   :  { %v241_v11 = vpop.permute.xlu0 %240 }
 0x117   :  { %v730_v42 = vpop.f32.mrb[0].mxu0 }
 0x118   :  { %v203_v43 = vadd.f32 %v730_v42, %v58_v41  ;;  %v197_v44 = vpop.f32.mrb[1].mxu0 }
 0x119   :  { %v198_v45 = vadd.f32 %v197_v44, %v53_v39 }
 0x11a   :  { %v217_v46 = vmax.f32 %v203_v43, 0.0 }
 0x11b   :  { %v216_v48 = vmax.f32 %v198_v45, 0.0  ;;  %v733_v49 = vpop.f32.mrb[2].mxu0 }
 0x11c   :  { %v213_v50 = vadd.f32 %v733_v49, %v68_v47  ;;  %v207_v51 = vpop.f32.mrb[3].mxu0 }
 0x11d   :  { %v208_v52 = vadd.f32 %v207_v51, %v63_v40  ;;  %v828_v53 = vpack.c.bf16 %v217_v46, %v216_v48 }
 0x11e   :  { %v219_v54 = vmax.f32 %v213_v50, 0.0 }
 0x11f   :  { %v218_v55 = vmax.f32 %v208_v52, 0.0  ;;  %829 = vmatprep.subr.bf16.mxu1 %v828_v53 }
 0x120   :  { %831 = vmatpush3.bf16.msra.mxu1 %v828_v53 }
 0x121   :  { %v832_v56 = vpack.c.bf16 %v219_v54, %v218_v55 }
 0x123   :  { %833 = vmatprep.subr.bf16.mxu1 %v832_v56 }
 0x124   :  { %835 = vmatpush3.bf16.msra.mxu1 %v832_v56 }
 0x125   :  { %837 = vmatprep.subr.bf16.mxu1 %v836_v62 }
 0x127   :  { %743 = vmatmul.mubr.msk.f32.vlgmr.msra.gmra.mrb[0].mxu1 %vm248_vm2, %v221_v57 }
 0x128   :  { %745 = vmatprep.mubr.msk.f32.mxu1 %vm248_vm2, %v222_v58  ;;  %839 = vmatpush3.bf16.msra.mxu1 %v836_v62 }
 0x129   :  { %841 = vmatprep.subr.bf16.mxu1 %v840_v10 }
 0x12b   :  { %746 = vmatmul.mubr.msk.f32.gmra.mrb[2].mxu1 %vm248_vm2, %v223_v59 }
 0x12c   :  { %843 = vmatpush3.bf16.msra.mxu1 %v840_v10 }
 0x1fa   :  { %v744_v63 = vpop.f32.mrb[0].mxu1 }
 0x1fb   :  { %v327_v1 = vpop.f32.mrb[1].mxu1  ;;  %v333_v4 = vadd.f32 %v744_v63, %v236_v3 }
 0x1fc   :  { %v328_v2 = vadd.f32 %v327_v1, %v231_v0 }
 0x1fd   :  { %v347_v12 = vmax.f32 %v333_v4, 0.0 }
 0x1fe   :  { %v346_v5 = vmax.f32 %v328_v2, 0.0  ;;  %v747_v6 = vpop.f32.mrb[2].mxu1 }
 0x1ff   :  { %v337_v9 = vpop.f32.mrb[3].mxu1  ;;  %v343_v15 = vadd.f32 %v747_v6, %v246_v14 }
 0x200   :  { %361 = vxpose.xlu0.b32.start [1/4] (short) %v346_v5, 128  ;;  %v338_v13 = vadd.f32 %v337_v9, %v241_v11 }
 0x201   :  { %v349_v17 = vmax.f32 %v343_v15, 0.0 }
 0x202   :  { %v348_v16 = vmax.f32 %v338_v13, 0.0 }
 0x204   :  { %362 = vxpose.xlu0.b32.cont [2/4] (short) %v347_v12, 128 }
 0x208   :  { %363 = vxpose.xlu0.b32.cont [3/4] (short) %v348_v16, 128 }
 0x20c   :  { %364 = vxpose.xlu0.b32.end [4/4] (short) %v349_v17, 128 }
 0x280   :  { %v377_v18 = vpop.trf.xlu0 }
 0x281   :  { %756 = vmatprep.mubr.msk.f32.mxu1 %vm248_vm2, %v377_v18 }
 0x284   :  { %v378_v19 = vpop.trf.xlu0 }
 0x285   :  { %757 = vmatmul.mubr.msk.f32.vlgmr.msra.gmra.mrb[4].mxu1 %vm248_vm2, %v378_v19 }
 0x288   :  { %v379_v20 = vpop.trf.xlu0 }
 0x289   :  { %759 = vmatprep.mubr.msk.f32.mxu1 %vm248_vm2, %v379_v20 }
 0x28c   :  { %v380_v21 = vpop.trf.xlu0 }
 0x28d   :  { %760 = vmatmul.mubr.msk.f32.gmra.mrb[6].mxu1 %vm248_vm2, %v380_v21 }
 0x290   :  { %v381_v22 = vpop.trf.xlu0 }
 0x291   :  { %762 = vmatprep.mubr.msk.f32.mxu1 %vm248_vm2, %v381_v22 }
 0x294   :  { %v382_v23 = vpop.trf.xlu0 }
 0x295   :  { %763 = vmatmul.mubr.msk.f32.gmra.mrb[8].mxu1 %vm248_vm2, %v382_v23 }
 0x298   :  { %v383_v24 = vpop.trf.xlu0 }
 0x299   :  { %765 = vmatprep.mubr.msk.f32.mxu1 %vm248_vm2, %v383_v24 }
 0x29c   :  { %v384_v25 = vpop.trf.xlu0 }
 0x29d   :  { %766 = vmatmul.mubr.msk.f32.gmra.mrb[10].mxu1 %vm248_vm2, %v384_v25 }
 0x2a0   :  { %v385_v26 = vpop.trf.xlu0 }
 0x2a1   :  { %768 = vmatprep.mubr.msk.f32.mxu1 %vm248_vm2, %v385_v26 }
 0x2a4   :  { %v386_v27 = vpop.trf.xlu0 }
 0x2a5   :  { %769 = vmatmul.mubr.msk.f32.gmra.mrb[12].mxu1 %vm248_vm2, %v386_v27 }
 0x2a8   :  { %v387_v28 = vpop.trf.xlu0 }
 0x2a9   :  { %771 = vmatprep.mubr.msk.f32.mxu1 %vm248_vm2, %v387_v28 }
 0x2ac   :  { %v388_v29 = vpop.trf.xlu0 }
 0x2ad   :  { %772 = vmatmul.mubr.msk.f32.gmra.mrb[14].mxu1 %vm248_vm2, %v388_v29 }
 0x2b0   :  { %v389_v30 = vpop.trf.xlu0 }
 0x2b1   :  { %774 = vmatprep.mubr.msk.f32.mxu1 %vm248_vm2, %v389_v30 }
 0x2b4   :  { %v390_v31 = vpop.trf.xlu0 }
 0x2b5   :  { %775 = vmatmul.mubr.msk.f32.gmra.mrb[16].mxu1 %vm248_vm2, %v390_v31 }
 0x2b8   :  { %v391_v32 = vpop.trf.xlu0 }
 0x2b9   :  { %777 = vmatprep.mubr.msk.f32.mxu1 %vm248_vm2, %v391_v32 }
 0x2bc   :  { %v392_v33 = vpop.trf.xlu0 }
 0x2bd   :  { %778 = vmatmul.mubr.msk.f32.gmra.mrb[18].mxu1 %vm248_vm2, %v392_v33 }
 0x358   :  { %v758_v35 = vpop.f32.mrb[4].mxu1 }
 0x359   :  { %v513_v36 = vadd.f32 %v758_v35, %v631_v34  ;;  %v507_v37 = vpop.f32.mrb[5].mxu1 }
 0x35a   :  { %v508_v38 = vadd.f32 %v631_v34, %v507_v37 }
 0x35b   :  { %588 = vst.msk [vmem:[%s1133_s7 + $0x8] sm:$0xff] %vm586_vm3, %v513_v36 }
 0x35c   :  { %587 = vst.msk [vmem:[%s1133_s7] sm:$0xff] %vm586_vm3, %v508_v38 }
 0x360   :  { %v761_v39 = vpop.f32.mrb[6].mxu1 }
 0x361   :  { %v523_v40 = vadd.f32 %v761_v39, %v631_v34  ;;  %v517_v41 = vpop.f32.mrb[7].mxu1 }
 0x362   :  { %v518_v42 = vadd.f32 %v631_v34, %v517_v41 }
 0x363   :  { %590 = vst.msk [vmem:[%s1133_s7 + $0x18] sm:$0xff] %vm586_vm3, %v523_v40 }
 0x364   :  { %589 = vst.msk [vmem:[%s1133_s7 + $0x10] sm:$0xff] %vm586_vm3, %v518_v42 }
 0x368   :  { %v764_v43 = vpop.f32.mrb[8].mxu1 }
 0x369   :  { %v533_v44 = vadd.f32 %v764_v43, %v631_v34  ;;  %v527_v45 = vpop.f32.mrb[9].mxu1 }
 0x36a   :  { %v528_v46 = vadd.f32 %v631_v34, %v527_v45 }
 0x36b   :  { %592 = vst.msk [vmem:[%s1133_s7 + $0x28] sm:$0xff] %vm586_vm3, %v533_v44 }
 0x36c   :  { %591 = vst.msk [vmem:[%s1133_s7 + $0x20] sm:$0xff] %vm586_vm3, %v528_v46 }
 0x370   :  { %v767_v47 = vpop.f32.mrb[10].mxu1 }
 0x371   :  { %v543_v48 = vadd.f32 %v767_v47, %v631_v34  ;;  %v537_v49 = vpop.f32.mrb[11].mxu1 }
 0x372   :  { %v538_v50 = vadd.f32 %v631_v34, %v537_v49 }
 0x373   :  { %594 = vst.msk [vmem:[%s1133_s7 + $0x38] sm:$0xff] %vm586_vm3, %v543_v48 }
 0x374   :  { %593 = vst.msk [vmem:[%s1133_s7 + $0x30] sm:$0xff] %vm586_vm3, %v538_v50 }
 0x378   :  { %v770_v51 = vpop.f32.mrb[12].mxu1 }
 0x379   :  { %v553_v52 = vadd.f32 %v770_v51, %v631_v34  ;;  %v547_v53 = vpop.f32.mrb[13].mxu1 }
 0x37a   :  { %v548_v54 = vadd.f32 %v631_v34, %v547_v53 }
 0x37b   :  { %596 = vst.msk [vmem:[%s1133_s7 + $0x48] sm:$0xff] %vm586_vm3, %v553_v52 }
 0x37c   :  { %595 = vst.msk [vmem:[%s1133_s7 + $0x40] sm:$0xff] %vm586_vm3, %v548_v54 }
 0x380   :  { %v773_v55 = vpop.f32.mrb[14].mxu1 }
 0x381   :  { %v563_v56 = vadd.f32 %v773_v55, %v631_v34  ;;  %v557_v57 = vpop.f32.mrb[15].mxu1 }
 0x382   :  { %v558_v58 = vadd.f32 %v631_v34, %v557_v57 }
 0x383   :  { %598 = vst.msk [vmem:[%s1133_s7 + $0x58] sm:$0xff] %vm586_vm3, %v563_v56 }
 0x384   :  { %597 = vst.msk [vmem:[%s1133_s7 + $0x50] sm:$0xff] %vm586_vm3, %v558_v58 }
 0x388   :  { %v776_v59 = vpop.f32.mrb[16].mxu1 }
 0x389   :  { %v573_v60 = vadd.f32 %v776_v59, %v631_v34  ;;  %v567_v61 = vpop.f32.mrb[17].mxu1 }
 0x38a   :  { %v568_v62 = vadd.f32 %v631_v34, %v567_v61 }
 0x38b   :  { %600 = vst.msk [vmem:[%s1133_s7 + $0x68] sm:$0xff] %vm586_vm3, %v573_v60 }
 0x38c   :  { %599 = vst.msk [vmem:[%s1133_s7 + $0x60] sm:$0xff] %vm586_vm3, %v568_v62 }
 0x390   :  { %v779_v63 = vpop.f32.mrb[18].mxu1 }
 0x391   :  { %v583_v0 = vadd.f32 %v779_v63, %v631_v34  ;;  %v577_v1 = vpop.f32.mrb[19].mxu1 }
 0x392   :  { %v578_v2 = vadd.f32 %v631_v34, %v577_v1 }
 0x393   :  { %602 = vst.msk [vmem:[%s1133_s7 + $0x78] sm:$0xff] %vm586_vm3, %v583_v0 }
 0x394   :  { %601 = vst.msk [vmem:[%s1133_s7 + $0x70] sm:$0xff] %vm586_vm3, %v578_v2 }

</bundles_post_ra>
